<compile_context>
chip_gen: v7x
topology: tpu7x:2x2x1
jax: 0.10.0
libtpu: 0.0.40
codegen_flags: <defaults>
</compile_context>

<pallas_src>
import functools

import jax
import jax.numpy as jnp
from jax import lax
from jax.experimental import pallas as pl
from jax.experimental.pallas import tpu as pltpu


def _ring_loss_kernel(radius_ref, x_ref, out_ref, acc_ref, *,
                      n_rows, row_tile, steps_per_block):
    # radius_ref : SMEM scalar-prefetch ref, shape (1,), f32
    # x_ref      : VMEM tile of x, shape (row_tile, D)
    # out_ref    : VMEM (1, 8, 128) partial-sum slab for this parallel block
    # acc_ref    : VMEM (row_tile, 1) f32 running accumulator (persists across s)
    p = pl.program_id(0)   # parallel axis: row super-blocks (megacore on v7x)
    s = pl.program_id(1)   # reduction axis: tiles within the super-block

    @pl.when(s == 0)
    def _():
        acc_ref[...] = jnp.zeros_like(acc_ref)

    x = x_ref[...].astype(jnp.float32)
    # per-row squared L2 norm -> (row_tile, 1)
    # TODO(synk): for very large D this lane-reduce could be moved to the MXU
    # via (x*x) @ ones((D,1)); unnecessary while the kernel is HBM-bound.
    sq = jnp.sum(x * x, axis=1, keepdims=True)
    r = radius_ref[0]                      # scalar read once, no broadcast tile
    d = jnp.sqrt(sq) - r
    dd = d * d

    # Mask rows past the true batch size (ragged last tile / clamped OOB tiles).
    tile_idx = p * steps_per_block + s
    row0 = tile_idx * row_tile
    row_ids = row0 + lax.broadcasted_iota(jnp.int32, (row_tile, 1), 0)
    dd = jnp.where(row_ids < n_rows, dd, 0.0)

    # Vector-shaped accumulation: no per-step reduce-to-scalar, no scalar RMW.
    acc_ref[...] += dd

    @pl.when(s == pl.num_programs(1) - 1)
    def _():
        total = jnp.sum(acc_ref[...])
        # Lane-dense, unmasked store of the per-block partial (splat the scalar).
        out_ref[...] = jnp.broadcast_to(total, out_ref.shape)


def _round_up(a: int, b: int) -> int:
    return (a + b - 1) // b * b


def ring_loss(x: jax.Array, radius: jax.Array, *,
              row_tile: int | None = None,
              n_parallel: int = 2,
              tile_bytes: int = 2 << 20) -> jax.Array:
    """RingLoss forward: mean over rows of (||x_i||_2 - radius)^2.

    x      : (N, D) float array
    radius : (1,)   float parameter
    """
    N, D = x.shape
    itemsize = jnp.dtype(x.dtype).itemsize

    # Pick a large row tile (~tile_bytes of input per step), multiple of 8,
    # never bigger than the (8-rounded) batch, capped so the double-buffered
    # input + lane-padded scratch stay well inside every generation's VMEM
    # budget (16 MiB scoped on v5e, 32 MiB on v6e/v7x).
    if row_tile is None:
        budget_rows = max(8, tile_bytes // max(1, D * itemsize))
        row_tile = min(4096, budget_rows)
    row_tile = max(8, _round_up(min(row_tile, _round_up(N, 8)), 8))

    n_tiles = pl.cdiv(N, row_tile)
    n_parallel = max(1, min(n_parallel, n_tiles))
    steps = pl.cdiv(n_tiles, n_parallel)
    grid = (n_parallel, steps)

    def x_index_map(p, s, radius_ref):
        # Clamp trailing fully-out-of-range tiles (their rows are masked to 0).
        return (jnp.minimum(p * steps + s, n_tiles - 1), 0)

    kernel = functools.partial(
        _ring_loss_kernel, n_rows=N, row_tile=row_tile, steps_per_block=steps)

    partials = pl.pallas_call(
        kernel,
        out_shape=jax.ShapeDtypeStruct((n_parallel, 8, 128), jnp.float32),
        grid_spec=pltpu.PrefetchScalarGridSpec(
            num_scalar_prefetch=1,
            grid=grid,
            in_specs=[pl.BlockSpec((row_tile, D), x_index_map)],
            out_specs=pl.BlockSpec((1, 8, 128),
                                   lambda p, s, radius_ref: (p, 0, 0)),
            scratch_shapes=[pltpu.VMEM((row_tile, 1), jnp.float32)],
        ),
        compiler_params=pltpu.CompilerParams(
            dimension_semantics=("parallel", "arbitrary"),
            vmem_limit_bytes=32 * 1024 * 1024,
        ),
    )(radius.astype(jnp.float32), x)

    # Tiny glue in plain JAX: sum the per-block partials and take the mean.
    total = jnp.sum(partials[:, 0, 0])
    return (total / jnp.float32(N)).astype(jnp.float32)


if __name__ == "__main__":
    key = jax.random.PRNGKey(0)
    N, D = 40, 64                       # small, N deliberately not a multiple of 8
    x = jax.random.normal(key, (N, D), dtype=jnp.float32)

    # nn.Parameter(torch.ones(1)) -> deterministic init to 1.0
    radius = jnp.ones((1,), dtype=jnp.float32)

    ref = jnp.mean((jnp.linalg.norm(x, axis=1) - radius[0]) ** 2)

    # Default (auto-sized) tiling path: single big tile for this small input.
    loss = jax.block_until_ready(ring_loss(x, radius))
    assert jnp.allclose(loss, ref, rtol=1e-5, atol=1e-5), (loss, ref)

    # Forced small tiles: exercises the multi-tile reduction, the 2-block
    # parallel axis with per-block partials, ragged-N masking and the clamped
    # trailing tile.
    loss2 = jax.block_until_ready(ring_loss(x, radius, row_tile=16, n_parallel=2))
    assert jnp.allclose(loss2, ref, rtol=1e-5, atol=1e-5), (loss2, ref)

    print("KERNEL_OK")
</pallas_src>

<mosaic_0001>
module attributes {stable_mosaic.version = 11 : i64} {
  func.func @_ring_loss_kernel(%arg0: i32, %arg1: i32, %arg2: memref<1xf32, #tpu.memory_space<smem>>, %arg3: memref<40x64xf32, #tpu.memory_space<vmem>>, %arg4: memref<1x8x128xf32, #tpu.memory_space<vmem>>, %arg5: memref<40x1xf32, #tpu.memory_space<vmem>>) attributes {dimension_semantics = [#tpu.dimension_semantics<parallel>, #tpu.dimension_semantics<arbitrary>], iteration_bounds = array<i64: 1, 1>, scalar_prefetch = 1 : i64, scratch_operands = 1 : i64, tpu.core_type = #tpu.core_type<tc>, window_params = [{transform_indices = @transform_0, window_bounds = array<i64: 40, 64>}, {transform_indices = @transform_1, window_bounds = array<i64: 1, 8, 128>}]} {
    %c0_i32 = arith.constant 0 : i32
    %0 = arith.cmpi eq, %arg1, %c0_i32 : i32
    %1 = arith.extui %0 : i1 to i32
    %c0_i32_0 = arith.constant 0 : i32
    %2 = arith.cmpi ne, %1, %c0_i32_0 : i32
    scf.if %2 {
      %cst_11 = arith.constant 0.000000e+00 : f32
      %28 = vector.broadcast %cst_11 : f32 to vector<40x1xf32>
      %c0_12 = arith.constant 0 : index
      %c0_13 = arith.constant 0 : index
      %29 = vector.load %arg5[%c0_12, %c0_13] : memref<40x1xf32, #tpu.memory_space<vmem>>, vector<40x1xf32>
      tpu.vector_store %arg5[%c0_12, %c0_13], %28 {strides = array<i32>} : memref<40x1xf32, #tpu.memory_space<vmem>>, vector<40x1xf32>,
    } else {
    }
    %c0 = arith.constant 0 : index
    %c0_1 = arith.constant 0 : index
    %3 = vector.load %arg3[%c0, %c0_1] : memref<40x64xf32, #tpu.memory_space<vmem>>, vector<40x64xf32>
    %4 = arith.mulf %3, %3 : vector<40x64xf32>
    %cst = arith.constant dense<0.000000e+00> : vector<40xf32>
    %5 = vector.multi_reduction <add>, %4, %cst [1] : vector<40x64xf32> to vector<40xf32>
    %6 = vector.shape_cast %5 : vector<40xf32> to vector<40x1xf32>
    %c0_2 = arith.constant 0 : index
    %7 = memref.load %arg2[%c0_2] : memref<1xf32, #tpu.memory_space<smem>>
    %8 = math.sqrt %6 : vector<40x1xf32>
    %9 = vector.broadcast %7 : f32 to vector<40x1xf32>
    %10 = arith.subf %8, %9 : vector<40x1xf32>
    %11 = arith.mulf %10, %10 : vector<40x1xf32>
    %c1_i32 = arith.constant 1 : i32
    %12 = arith.muli %arg0, %c1_i32 : i32
    %13 = arith.addi %12, %arg1 : i32
    %c40_i32 = arith.constant 40 : i32
    %14 = arith.muli %13, %c40_i32 : i32
    %15 = tpu.iota {dimensions = array<i32: 0>} : vector<40x1xi32>
    %16 = vector.broadcast %14 : i32 to vector<40x1xi32>
    %17 = arith.addi %16, %15 : vector<40x1xi32>
    %c40_i32_3 = arith.constant 40 : i32
    %18 = vector.broadcast %c40_i32_3 : i32 to vector<40x1xi32>
    %19 = arith.cmpi slt, %17, %18 : vector<40x1xi32>
    %cst_4 = arith.constant 0.000000e+00 : f32
    %20 = vector.broadcast %cst_4 : f32 to vector<40x1xf32>
    %21 = arith.select %19, %11, %20 : vector<40x1xi1>, vector<40x1xf32>
    %c0_5 = arith.constant 0 : index
    %c0_6 = arith.constant 0 : index
    %22 = vector.load %arg5[%c0_5, %c0_6] : memref<40x1xf32, #tpu.memory_space<vmem>>, vector<40x1xf32>
    %23 = arith.addf %22, %21 : vector<40x1xf32>
    %c0_7 = arith.constant 0 : index
    %c0_8 = arith.constant 0 : index
    %24 = vector.load %arg5[%c0_7, %c0_8] : memref<40x1xf32, #tpu.memory_space<vmem>>, vector<40x1xf32>
    tpu.vector_store %arg5[%c0_7, %c0_8], %23 {strides = array<i32>} : memref<40x1xf32, #tpu.memory_space<vmem>>, vector<40x1xf32>,
    %c0_i32_9 = arith.constant 0 : i32
    %25 = arith.cmpi eq, %arg1, %c0_i32_9 : i32
    %26 = arith.extui %25 : i1 to i32
    %c0_i32_10 = arith.constant 0 : i32
    %27 = arith.cmpi ne, %26, %c0_i32_10 : i32
    scf.if %27 {
      %c0_11 = arith.constant 0 : index
      %c0_12 = arith.constant 0 : index
      %28 = vector.load %arg5[%c0_11, %c0_12] : memref<40x1xf32, #tpu.memory_space<vmem>>, vector<40x1xf32>
      %29 = vector.shape_cast %28 : vector<40x1xf32> to vector<1x40x1xf32>
      %cst_13 = arith.constant dense<0.000000e+00> : vector<1xf32>
      %30 = vector.multi_reduction <add>, %29, %cst_13 [1, 2] : vector<1x40x1xf32> to vector<1xf32>
      %31 = vector.shape_cast %30 : vector<1xf32> to vector<1x1x1xf32>
      %32 = vector.extract %31[0, 0, 0] : f32 from vector<1x1x1xf32>
      %33 = vector.broadcast %32 : f32 to vector<1x8x128xf32>
      %c0_14 = arith.constant 0 : index
      %c0_15 = arith.constant 0 : index
      %c0_16 = arith.constant 0 : index
      %34 = vector.load %arg4[%c0_14, %c0_15, %c0_16] : memref<1x8x128xf32, #tpu.memory_space<vmem>>, vector<1x8x128xf32>
      tpu.vector_store %arg4[%c0_14, %c0_15, %c0_16], %33 {strides = array<i32>} : memref<1x8x128xf32, #tpu.memory_space<vmem>>, vector<1x8x128xf32>,
    } else {
    }
    return
  }
  func.func @transform_0(%arg0: i32, %arg1: i32, %arg2: memref<1xf32, #tpu.memory_space<smem>>) -> (i32, i32) {
    %c1_i32 = arith.constant 1 : i32
    %0 = arith.muli %arg0, %c1_i32 : i32
    %1 = arith.addi %0, %arg1 : i32
    %c0_i32 = arith.constant 0 : i32
    %2 = arith.minsi %1, %c0_i32 : i32
    %c0_i32_0 = arith.constant 0 : i32
    %c0_i32_1 = arith.constant 0 : i32
    return %2, %c0_i32_0 : i32, i32
  }
  func.func @transform_1(%arg0: i32, %arg1: i32, %arg2: memref<1xf32, #tpu.memory_space<smem>>) -> (i32, i32, i32) {
    %c0_i32 = arith.constant 0 : i32
    %c0_i32_0 = arith.constant 0 : i32
    %c0_i32_1 = arith.constant 0 : i32
    return %arg0, %c0_i32, %c0_i32_0 : i32, i32, i32
  }
}

</mosaic_0001>

<bundles_post_ra>
// kernel: tpu_custom_call.1
= control target key start
LH: loop header
LB: loop body
LE: loop exit
PB: predicated region body
PF: predicated region fallthrough
CT: control target
= control target key end

     0   :  { %8 = vsyncpa [#allocation6], 0  ;;  %s335_s0 = inlined_call_operand.<no memory space> [shape: f32[1], index: 0, kind: input, shape index: {}]   ;;  %s336_s1 = inlined_call_operand.hbm [shape: f32[40,64], index: 1, kind: input, shape index: {}]   ;;  %s337_s2 = inlined_call_operand.hbm [shape: f32[1,8,128], index: 2, kind: output, shape index: {}]  }
   0x1   :  { %9 = vsyncpa [#allocation7], 0  ;;  %s268_s9 = smov [#allocation5]   ;;  %s220_s13 = scalar_lea.hbm %s336_s1, 640 }
   0x2   :  { %s21_s10 = sshll.u32 %s268_s9, 4  ;;  %p221_p0 = scmp.ne.s32.totalorder %s336_s1, %s220_s13  ;;  %s22_s10 = int_to_ptr.vmem [resolvable:$true] %s21_s10 }
   0x3   :  { %p224_p1 = scmp.lt.u32.totalorder %s220_s13, %s336_s1 }
   0x5   :  { %p226_p2 = pnand %p224_p1, %p221_p0 }
   0x7   :  { %229 = shalt.err (!%p226_p2)
}
   0x8   :  { %s230_s18 = scalar_lea.vmem %s22_s10, 640  ;;  %p235_p4 = scmp.lt.s32.totalorder %s22_s10, %s22_s10 }
   0x9   :  { %p231_p3 = scmp.ne.s32.totalorder %s22_s10, %s230_s18  ;;  %p236_p5 = scmp.lt.s32.totalorder %s230_s18, %s230_s18 }
   0xb   :  { %p237_p6 = por %p236_p5, %p235_p4 }
   0xd   :  { %p238_p7 = pnand %p237_p6, %p231_p3 }
   0xf   :  { %241 = shalt.err (!%p238_p7)
}
  0x10   :  { %s269_s19 = smov 128   ;;  %s270_s20 = smov 8  }
  0x11   :  { %27 = dma.hbm_to_vmem [thread:$0]  %s336_s1, 640, %s22_s10, [#allocation6], %s269_s19, %s269_s19, %s270_s20  }
  0x12   :  { %264 = dma.done.wait [#allocation6], 640  }
  0x13   :  { %265 = vsyncadd [#allocation6], 4294966656  ;;  %vm39_vm0 = vcmask 7168   ;;  %v271_v0 = vmov 0.0   ;;  %v47_v1 = vld [vmem:[#allocation5 + $0x10] sm:$0xff]  ;;  %vm55_vm1 = vcmask 523264   ;;  %v107_v24 = vstv %s335_s0 }
  0x14   :  { %42 = vst.msk [vmem:[#allocation2 + $0x10] sm:$0xff] %vm39_vm0, %v271_v0  ;;  %40 = vst.msk [vmem:[#allocation2] sm:$0xff] %vm39_vm0, %v271_v0  ;;  %v45_v2 = vld [vmem:[#allocation5] sm:$0xff]  ;;  %v48_v3 = vld [vmem:[#allocation5 + $0x18] sm:$0xff]  ;;  %v52_v4 = vmul.f32 %v47_v1, %v47_v1  ;;  %s272_s0 = smov [#allocation8]  }
  0x15   :  { %41 = vst.msk [vmem:[#allocation2 + $0x8] sm:$0xff] %vm39_vm0, %v271_v0  ;;  %43 = vst.msk [vmem:[#allocation2 + $0x18] sm:$0xff] %vm39_vm0, %v271_v0  ;;  %v50_v5 = vmul.f32 %v45_v2, %v45_v2  ;;  %v53_v6 = vmul.f32 %v48_v3, %v48_v3  ;;  %v46_v7 = vld [vmem:[#allocation5 + $0x8] sm:$0xff]  ;;  %v49_v9 = vld [vmem:[#allocation5 + $0x20] sm:$0xff]  ;;  %s192_s24 = sshll.u32 %s272_s0, 4  ;;  %s193_s24 = int_to_ptr.vmem [resolvable:$true] %s192_s24 }
  0x16   :  { %44 = vst.msk [vmem:[#allocation2 + $0x20] sm:$0xff] %vm39_vm0, %v271_v0  ;;  %v51_v8 = vmul.f32 %v46_v7, %v46_v7  ;;  %v62_v10 = vsel %vm55_vm1, %v52_v4, 0.0  ;;  %v54_v14 = vmul.f32 %v49_v9, %v49_v9  ;;  %s242_s26 = scalar_lea.vmem %s193_s24, 128  ;;  %p247_p9 = scmp.lt.s32.totalorder %s193_s24, %s193_s24 }
  0x17   :  { %v56_v11 = vsel %vm55_vm1, %v50_v5, 0.0  ;;  %63 = vadd.xlane.f32.xlu1 %v62_v10  ;;  %v65_v12 = vsel %vm55_vm1, %v53_v6, 0.0  ;;  %p243_p8 = scmp.ne.s32.totalorder %s193_s24, %s242_s26  ;;  %p248_p10 = scmp.lt.s32.totalorder %s242_s26, %s242_s26 }
  0x18   :  { %57 = vadd.xlane.f32.xlu0 %v56_v11  ;;  %v59_v13 = vsel %vm55_vm1, %v51_v8, 0.0  ;;  %v68_v15 = vsel %vm55_vm1, %v54_v14, 0.0 }
  0x19   :  { %p249_p11 = por %p248_p10, %p247_p9 }
  0x1b   :  { %66 = vadd.xlane.f32.xlu1 %v65_v12  ;;  %v144_v36 = vld [vmem:[#allocation2 + $0x10] sm:$0xff]  ;;  %v142_v41 = vld [vmem:[#allocation2] sm:$0xff]  ;;  %p250_p12 = pnand %p249_p11, %p243_p8 }
  0x1c   :  { %60 = vadd.xlane.f32.xlu0 %v59_v13  ;;  %v145_v53 = vld [vmem:[#allocation2 + $0x18] sm:$0xff]  ;;  %v143_v57 = vld [vmem:[#allocation2 + $0x8] sm:$0xff] }
  0x1d   :  { %v146_v0 = vld [vmem:[#allocation2 + $0x20] sm:$0xff] }
  0x20   :  { %69 = vadd.xlane.f32.xlu0 %v68_v15 }
  0xa4   :  { %v64_v16 = vpop.xlane.xlu1 %63 }
  0xa5   :  { %v58_v17 = vpop.xlane.xlu0 %57  ;;  %210 = vrsqrt.f32 %v64_v16  ;;  %vm88_vm2 = vcmp.eq.f32.partialorder %v64_v16, inf  ;;  %v91_v25 = vand.u32 2147483648, %v64_v16  ;;  %vm90_vm3 = vcmp.eq.f32.partialorder %v64_v16, 0.0 }
  0xa6   :  { %212 = vrsqrt.f32 %v58_v17  ;;  %vm74_vm4 = vcmp.eq.f32.partialorder %v58_v17, inf  ;;  %v77_v28 = vand.u32 2147483648, %v58_v17  ;;  %vm76_vm5 = vcmp.eq.f32.partialorder %v58_v17, 0.0 }
  0xa8   :  { %v67_v18 = vpop.xlane.xlu1 %66 }
  0xa9   :  { %v61_v19 = vpop.xlane.xlu0 %60  ;;  %214 = vrsqrt.f32 %v67_v18  ;;  %vm95_vm6 = vcmp.eq.f32.partialorder %v67_v18, inf  ;;  %vm97_vm7 = vcmp.eq.f32.partialorder %v67_v18, 0.0  ;;  %v98_v38 = vand.u32 2147483648, %v67_v18 }
  0xaa   :  { %216 = vrsqrt.f32 %v61_v19  ;;  %vm81_vm8 = vcmp.eq.f32.partialorder %v61_v19, inf  ;;  %v84_v43 = vand.u32 2147483648, %v61_v19  ;;  %vm83_vm9 = vcmp.eq.f32.partialorder %v61_v19, 0.0 }
  0xad   :  { %v70_v20 = vpop.xlane.xlu0 %69 }
  0xae   :  { %218 = vrsqrt.f32 %v70_v20  ;;  %vm102_vm10 = vcmp.eq.f32.partialorder %v70_v20, inf  ;;  %v105_v55 = vand.u32 2147483648, %v70_v20  ;;  %vm104_vm11 = vcmp.eq.f32.partialorder %v70_v20, 0.0 }
  0xaf   :  { %v211_v21 = vpop.eup %210 }
  0xb0   :  { %v213_v22 = vpop.eup %212  ;;  %v87_v23 = vmul.f32 %v211_v21, %v64_v16 }
  0xb1   :  { %v73_v26 = vmul.f32 %v213_v22, %v58_v17 }
  0xb2   :  { %v89_v27 = vsel %vm88_vm2, %v64_v16, %v87_v23 }
  0xb3   :  { %v215_v29 = vpop.eup %214  ;;  %v92_v30 = vsel %vm90_vm3, %v91_v25, %v89_v27  ;;  %v75_v31 = vsel %vm74_vm4, %v58_v17, %v73_v26 }
  0xb4   :  { %v217_v32 = vpop.eup %216  ;;  %v110_v33 = vsub.f32 %v92_v30, %v107_v24  ;;  %v78_v34 = vsel %vm76_vm5, %v77_v28, %v75_v31  ;;  %v94_v35 = vmul.f32 %v215_v29, %v67_v18 }
  0xb5   :  { %v108_v37 = vsub.f32 %v78_v34, %v107_v24  ;;  %v80_v39 = vmul.f32 %v217_v32, %v61_v19 }
  0xb6   :  { %v115_v40 = vmul.f32 %v110_v33, %v110_v33  ;;  %v96_v42 = vsel %vm95_vm6, %v67_v18, %v94_v35 }
  0xb7   :  { %v113_v45 = vmul.f32 %v108_v37, %v108_v37  ;;  %v99_v46 = vsel %vm97_vm7, %v98_v38, %v96_v42  ;;  %v82_v47 = vsel %vm81_vm8, %v61_v19, %v80_v39 }
  0xb8   :  { %v219_v44 = vpop.eup %218  ;;  %v149_v48 = vadd.f32 %v144_v36, %v115_v40  ;;  %v111_v49 = vsub.f32 %v99_v46, %v107_v24  ;;  %v85_v50 = vsel %vm83_vm9, %v84_v43, %v82_v47 }
  0xb9   :  { %v101_v51 = vmul.f32 %v219_v44, %v70_v20  ;;  %v147_v52 = vadd.f32 %v142_v41, %v113_v45  ;;  %v109_v54 = vsub.f32 %v85_v50, %v107_v24 }
  0xba   :  { %155 = vst.msk [vmem:[#allocation2 + $0x10] sm:$0xff] %vm39_vm0, %v149_v48  ;;  %v116_v56 = vmul.f32 %v111_v49, %v111_v49 }
  0xbb   :  { %v103_v58 = vsel %vm102_vm10, %v70_v20, %v101_v51  ;;  %153 = vst.msk [vmem:[#allocation2] sm:$0xff] %vm39_vm0, %v147_v52  ;;  %v114_v59 = vmul.f32 %v109_v54, %v109_v54 }
  0xbc   :  { %v106_v60 = vsel %vm104_vm11, %v105_v55, %v103_v58  ;;  %v150_v61 = vadd.f32 %v145_v53, %v116_v56 }
  0xbd   :  { %v112_v62 = vsub.f32 %v106_v60, %v107_v24  ;;  %v148_v63 = vadd.f32 %v143_v57, %v114_v59 }
  0xbe   :  { %156 = vst.msk [vmem:[#allocation2 + $0x18] sm:$0xff] %vm39_vm0, %v150_v61 }
  0xbf   :  { %v117_v1 = vmul.f32 %v112_v62, %v112_v62  ;;  %154 = vst.msk [vmem:[#allocation2 + $0x8] sm:$0xff] %vm39_vm0, %v148_v63 }
  0xc1   :  { %v151_v2 = vadd.f32 %v146_v0, %v117_v1  ;;  %v163_v5 = vld [vmem:[#allocation2 + $0x10] sm:$0xff] }
  0xc2   :  { %v161_v3 = vld [vmem:[#allocation2] sm:$0xff]  ;;  %v169_v10 = vsel %vm39_vm0, %v163_v5, 0.0 }
  0xc3   :  { %157 = vst.msk [vmem:[#allocation2 + $0x20] sm:$0xff] %vm39_vm0, %v151_v2  ;;  %v166_v6 = vsel %vm39_vm0, %v161_v3, 0.0 }
  0xc5   :  { %v164_v8 = vld [vmem:[#allocation2 + $0x18] sm:$0xff] }
  0xc6   :  { %v162_v4 = vld [vmem:[#allocation2 + $0x8] sm:$0xff]  ;;  %v171_v13 = vsel %vm39_vm0, %v164_v8, 0.0 }
  0xc7   :  { %v167_v7 = vsel %vm39_vm0, %v162_v4, 0.0 }
  0xc8   :  { %v168_v9 = vadd.f32 %v167_v7, %v166_v6 }
  0xca   :  { %v165_v11 = vld [vmem:[#allocation2 + $0x20] sm:$0xff]  ;;  %v170_v12 = vadd.f32 %v169_v10, %v168_v9 }
  0xcb   :  { %v173_v15 = vsel %vm39_vm0, %v165_v11, 0.0 }
  0xcc   :  { %v172_v14 = vadd.f32 %v171_v13, %v170_v12 }
  0xce   :  { %v174_v16 = vadd.f32 %v173_v15, %v172_v14 }
  0xd0   :  { %175 = vadd.xlane.f32.xlu1 %v174_v16 }
 0x15d   :  { %v176_v17 = vpop.xlane.xlu1 %175 }
 0x15e   :  { %v177_v18 = vrot.slane %v176_v17, 4 }
 0x160   :  { %v178_v19 = vadd.f32 %v177_v18, %v176_v17 }
 0x162   :  { %v179_v20 = vrot.slane %v178_v19, 2 }
 0x164   :  { %v180_v21 = vadd.f32 %v179_v20, %v178_v19 }
 0x166   :  { %v181_v22 = vrot.slane %v180_v21, 1 }
 0x168   :  { %v182_v23 = vadd.f32 %v181_v22, %v180_v21 }
 0x16a   :  { %203 = vpush %v182_v23 }
 0x19b   :  { %s204_s25 = spop %203 }
 0x19c   :  { %v184_v24 = vstv %s204_s25 }
 0x19d   :  { %185 = vst [vmem:[#allocation8] sm:$0xff] %v184_v24 }
 0x19e   :  { %253 = shalt.err (!%p250_p12)
}
 0x19f   :  { %s254_s29 = scalar_lea.hbm %s337_s2, 128 }
 0x1a0   :  { %p255_p13 = scmp.ne.s32.totalorder %s337_s2, %s254_s29  ;;  %p258_p0 = scmp.lt.u32.totalorder %s254_s29, %s337_s2 }
 0x1a2   :  { %p260_p1 = pnand %p258_p0, %p255_p13 }
 0x1a4   :  { %263 = shalt.err (!%p260_p1)
}
 0x1a5   :  { %195 = dma.vmem_to_hbm [thread:$0]  %s193_s24, 128, %s337_s2, [#allocation7]  }
 0x1a6   :  { %266 = dma.done.wait [#allocation7], 128  }
 0x1a7   :  { %267 = vsyncadd [#allocation7], 4294967168 }
 0x1a8   :  { %199 = vsyncpa [#allocation6], 1 }
 0x1a9   :  { %200 = vsyncpa [#allocation7], 1 }

</bundles_post_ra>
